<compile_context>
chip_gen: v7x
topology: tpu7x:2x2x1
jax: 0.10.0
libtpu: 0.0.40
codegen_flags: <defaults>
</compile_context>

<pallas_src>
import jax
import jax.numpy as jnp
from jax.experimental import pallas as pl
from jax.experimental.pallas import tpu as pltpu


_PREFERRED_COLS = (1024, 512, 256, 128)   # lane-dense widths (multiples of 128)
_TARGET_TILE_BYTES = 4 * 1024 * 1024      # ~4 MiB per buffer
_VMEM_LIMIT_BYTES = 48 * 1024 * 1024      # > v5e/v6e scoped default, < v7x 64 MiB physical


def _fuse2_kernel(cur_ref, oth_ref, out_ref):
    # Pure VPU elementwise add on the current VMEM tile.
    out_ref[...] = cur_ref[...] + oth_ref[...]


def fuse2(cur: jax.Array, others: jax.Array) -> jax.Array:
    """Pallas implementation of Fuse2.forward(cur, others) = cur + others."""
    assert cur.shape == others.shape and cur.dtype == others.dtype
    orig_shape = cur.shape
    dtype = cur.dtype
    itemsize = jnp.dtype(dtype).itemsize
    n = cur.size

    # ---- pick a lane-dense column width that avoids padding if possible ----
    cols = None
    for c in _PREFERRED_COLS:
        if n % c == 0:
            cols = c
            break
    padded = cols is None
    if padded:
        cols = _PREFERRED_COLS[0]          # pad by at most cols-1 elements

    n_pad = pl.cdiv(n, cols) * cols
    cur_f = cur.reshape(-1)                # reshape of contiguous array: no copy
    oth_f = others.reshape(-1)
    if padded:
        pad = n_pad - n
        cur_f = jnp.pad(cur_f, (0, pad))
        oth_f = jnp.pad(oth_f, (0, pad))

    rows = n_pad // cols
    cur2 = cur_f.reshape(rows, cols)
    oth2 = oth_f.reshape(rows, cols)

    # ---- row tile: ~4 MiB per buffer, dtype-aware sublane alignment --------
    # f32 -> 8, bf16 -> 16, int8/fp8 -> 32 rows per packed vreg sublane group.
    sub = max(8, 32 // itemsize)
    tile_rows = _TARGET_TILE_BYTES // (cols * itemsize)
    tile_rows = max(sub, tile_rows - (tile_rows % sub))
    if rows <= tile_rows:
        # Single exact block (block dim == full array dim): no masking, no
        # wasted VMEM, no extra grid-step overhead on 1-TC chips.
        tile_rows = rows
    grid = (pl.cdiv(rows, tile_rows),)     # partial final block is masked

    out2 = pl.pallas_call(
        _fuse2_kernel,
        out_shape=jax.ShapeDtypeStruct((rows, cols), dtype),
        grid_spec=pltpu.PrefetchScalarGridSpec(
            num_scalar_prefetch=0,
            grid=grid,
            in_specs=[
                pl.BlockSpec((tile_rows, cols), lambda i: (i, 0)),
                pl.BlockSpec((tile_rows, cols), lambda i: (i, 0)),
            ],
            out_specs=pl.BlockSpec((tile_rows, cols), lambda i: (i, 0)),
        ),
        compiler_params=pltpu.CompilerParams(
            # "parallel" lets Mosaic shard row tiles across v7x's two
            # TensorCores; harmless elsewhere.
            dimension_semantics=("parallel",),
            # Unified tile size across generations; explicit limit so the
            # 4 MiB tiles compile on v5e (16 MiB scoped default) and stay
            # under v7x's 64 MiB physical VMEM.
            vmem_limit_bytes=_VMEM_LIMIT_BYTES,
        ),
        cost_estimate=pl.CostEstimate(
            flops=rows * cols,
            transcendentals=0,
            bytes_accessed=3 * rows * cols * itemsize,  # rows actually streamed
        ),
    )(cur2, oth2)

    # ---- restore original NCHW layout (slice only if we padded) ------------
    if padded:
        return out2.reshape(-1)[:n].reshape(orig_shape)
    return out2.reshape(orig_shape)


if __name__ == "__main__":
    key = jax.random.PRNGKey(0)
    k1, k2, k3, k4 = jax.random.split(key, 4)

    # Small NCHW shapes consistent with the module's forward.
    B, C, H, W = 2, 4, 16, 16
    cur = jax.random.normal(k1, (B, C, H, W), dtype=jnp.float32)
    others = jax.random.normal(k2, (B, C, H, W), dtype=jnp.float32)

    out = fuse2(cur, others)
    jax.block_until_ready(out)
    ref = cur + others
    assert out.shape == ref.shape and out.dtype == ref.dtype
    assert jnp.allclose(out, ref, atol=1e-6), "mismatch vs reference (16x16)"

    # Second check: non-128-multiple spatial size (7x7) exercises the
    # pad-to-1024 fallback path.
    cur7 = jax.random.normal(k3, (2, 4, 7, 7), dtype=jnp.float32)
    oth7 = jax.random.normal(k4, (2, 4, 7, 7), dtype=jnp.float32)
    out7 = fuse2(cur7, oth7)
    jax.block_until_ready(out7)
    ref7 = cur7 + oth7
    assert out7.shape == ref7.shape and out7.dtype == ref7.dtype
    assert jnp.allclose(out7, ref7, atol=1e-6), "mismatch vs reference (7x7)"

    print("KERNEL_OK")
</pallas_src>

<mosaic_0001>
module attributes {stable_mosaic.version = 11 : i64} {
  func.func @_fuse2_kernel(%arg0: i32, %arg1: memref<2x1024xf32, #tpu.memory_space<vmem>>, %arg2: memref<2x1024xf32, #tpu.memory_space<vmem>>, %arg3: memref<2x1024xf32, #tpu.memory_space<vmem>>) attributes {dimension_semantics = [#tpu.dimension_semantics<parallel>], iteration_bounds = array<i64: 1>, scalar_prefetch = 0 : i64, scratch_operands = 0 : i64, tpu.core_type = #tpu.core_type<tc>, window_params = [{transform_indices = @transform_0, window_bounds = array<i64: 2, 1024>}, {transform_indices = @transform_1, window_bounds = array<i64: 2, 1024>}, {transform_indices = @transform_2, window_bounds = array<i64: 2, 1024>}]} {
    %c0 = arith.constant 0 : index
    %c0_0 = arith.constant 0 : index
    %0 = vector.load %arg1[%c0, %c0_0] : memref<2x1024xf32, #tpu.memory_space<vmem>>, vector<2x1024xf32>
    %c0_1 = arith.constant 0 : index
    %c0_2 = arith.constant 0 : index
    %1 = vector.load %arg2[%c0_1, %c0_2] : memref<2x1024xf32, #tpu.memory_space<vmem>>, vector<2x1024xf32>
    %2 = arith.addf %0, %1 : vector<2x1024xf32>
    %c0_3 = arith.constant 0 : index
    %c0_4 = arith.constant 0 : index
    %3 = vector.load %arg3[%c0_3, %c0_4] : memref<2x1024xf32, #tpu.memory_space<vmem>>, vector<2x1024xf32>
    tpu.vector_store %arg3[%c0_3, %c0_4], %2 {strides = array<i32>} : memref<2x1024xf32, #tpu.memory_space<vmem>>, vector<2x1024xf32>,
    return
  }
  func.func @transform_0(%arg0: i32) -> (i32, i32) {
    %c0_i32 = arith.constant 0 : i32
    %c0_i32_0 = arith.constant 0 : i32
    return %arg0, %c0_i32 : i32, i32
  }
  func.func @transform_1(%arg0: i32) -> (i32, i32) {
    %c0_i32 = arith.constant 0 : i32
    %c0_i32_0 = arith.constant 0 : i32
    return %arg0, %c0_i32 : i32, i32
  }
  func.func @transform_2(%arg0: i32) -> (i32, i32) {
    %c0_i32 = arith.constant 0 : i32
    %c0_i32_0 = arith.constant 0 : i32
    return %arg0, %c0_i32 : i32, i32
  }
}

</mosaic_0001>

<bundles_post_ra>
// kernel: tpu_custom_call.1
= control target key start
LH: loop header
LB: loop body
LE: loop exit
PB: predicated region body
PF: predicated region fallthrough
CT: control target
= control target key end

     0   :  { %7 = vsyncpa [#allocation3], 0  ;;  %s189_s0 = inlined_call_operand.hbm [shape: f32[2,1024], index: 0, kind: input, shape index: {}]   ;;  %s190_s1 = inlined_call_operand.hbm [shape: f32[2,1024], index: 1, kind: input, shape index: {}]   ;;  %s191_s2 = inlined_call_operand.hbm [shape: f32[2,1024], index: 2, kind: output, shape index: {}]  }
   0x1   :  { %8 = vsyncpa [#allocation6], 0 }
   0x2   :  { %9 = vsyncpa [#allocation4], 0  ;;  %s135_s9 = smov [#allocation2]   ;;  %s136_s11 = smov [#allocation5]  }
   0x3   :  { %s16_s10 = sshll.u32 %s135_s9, 4  ;;  %s26_s12 = sshll.u32 %s136_s11, 4  ;;  %s17_s10 = int_to_ptr.vmem [resolvable:$true] %s16_s10  ;;  %s27_s12 = int_to_ptr.vmem [resolvable:$true] %s26_s12 }
   0x4   :  { %s63_s15 = scalar_lea.hbm %s189_s0, 256 }
   0x5   :  { %p64_p0 = scmp.ne.s32.totalorder %s189_s0, %s63_s15  ;;  %p67_p1 = scmp.lt.u32.totalorder %s63_s15, %s189_s0 }
   0x7   :  { %p69_p2 = pnand %p67_p1, %p64_p0 }
   0x9   :  { %72 = shalt.err (!%p69_p2)
}
   0xa   :  { %s73_s20 = scalar_lea.vmem %s17_s10, 256  ;;  %p78_p4 = scmp.lt.s32.totalorder %s17_s10, %s17_s10 }
   0xb   :  { %p74_p3 = scmp.ne.s32.totalorder %s17_s10, %s73_s20  ;;  %p79_p5 = scmp.lt.s32.totalorder %s73_s20, %s73_s20 }
   0xd   :  { %p80_p6 = por %p79_p5, %p78_p4 }
   0xf   :  { %p81_p7 = pnand %p80_p6, %p74_p3 }
  0x11   :  { %84 = shalt.err (!%p81_p7)
}
  0x12   :  { %19 = dma.hbm_to_vmem [thread:$0]  %s189_s0, 256, %s17_s10, [#allocation3]  }
  0x13   :  { %s85_s25 = scalar_lea.hbm %s190_s1, 256 }
  0x14   :  { %p86_p8 = scmp.ne.s32.totalorder %s190_s1, %s85_s25  ;;  %p89_p9 = scmp.lt.u32.totalorder %s85_s25, %s190_s1 }
  0x16   :  { %p91_p10 = pnand %p89_p9, %p86_p8 }
  0x18   :  { %94 = shalt.err (!%p91_p10)
}
  0x19   :  { %s95_s30 = scalar_lea.vmem %s27_s12, 256  ;;  %p100_p12 = scmp.lt.s32.totalorder %s27_s12, %s27_s12 }
  0x1a   :  { %p96_p11 = scmp.ne.s32.totalorder %s27_s12, %s95_s30  ;;  %p101_p13 = scmp.lt.s32.totalorder %s95_s30, %s95_s30 }
  0x1c   :  { %p102_p0 = por %p101_p13, %p100_p12 }
  0x1e   :  { %p103_p1 = pnand %p102_p0, %p96_p11 }
  0x20   :  { %106 = shalt.err (!%p103_p1)
}
  0x21   :  { %29 = dma.hbm_to_vmem [thread:$0]  %s190_s1, 256, %s27_s12, [#allocation6]  }
  0x22   :  { %129 = dma.done.wait [#allocation3], 256  }
  0x23   :  { %130 = vsyncadd [#allocation3], 4294967040 }
  0x24   :  { %131 = dma.done.wait [#allocation6], 256  }
  0x25   :  { %132 = vsyncadd [#allocation6], 4294967040  ;;  %s137_s4 = smov [#allocation7]   ;;  %v36_v0 = vld [vmem:[#allocation2] sm:$0xff]  ;;  %v38_v1 = vld [vmem:[#allocation5] sm:$0xff] }
  0x26   :  { %s50_s5 = sshll.u32 %s137_s4, 4  ;;  %v37_v2 = vld [vmem:[#allocation2 + $0x8] sm:$0xff]  ;;  %v40_v3 = vadd.f32 %v38_v1, %v36_v0  ;;  %v39_v4 = vld [vmem:[#allocation5 + $0x8] sm:$0xff]  ;;  %s51_s5 = int_to_ptr.vmem [resolvable:$true] %s50_s5 }
  0x27   :  { %v41_v5 = vadd.f32 %v39_v4, %v37_v2  ;;  %s107_s6 = scalar_lea.vmem %s51_s5, 256  ;;  %p112_p3 = scmp.lt.s32.totalorder %s51_s5, %s51_s5 }
  0x28   :  { %42 = vst [vmem:[#allocation7] sm:$0xff] %v40_v3  ;;  %p108_p2 = scmp.ne.s32.totalorder %s51_s5, %s107_s6  ;;  %p113_p4 = scmp.lt.s32.totalorder %s107_s6, %s107_s6 }
  0x29   :  { %43 = vst [vmem:[#allocation7 + $0x8] sm:$0xff] %v41_v5 }
  0x2a   :  { %p114_p5 = por %p113_p4, %p112_p3 }
  0x2c   :  { %p115_p6 = pnand %p114_p5, %p108_p2 }
  0x2e   :  { %118 = shalt.err (!%p115_p6)
}
  0x2f   :  { %s119_s8 = scalar_lea.hbm %s191_s2, 256 }
  0x30   :  { %p120_p7 = scmp.ne.s32.totalorder %s191_s2, %s119_s8  ;;  %p123_p8 = scmp.lt.u32.totalorder %s119_s8, %s191_s2 }
  0x32   :  { %p125_p9 = pnand %p123_p8, %p120_p7 }
  0x34   :  { %128 = shalt.err (!%p125_p9)
}
  0x35   :  { %53 = dma.vmem_to_hbm [thread:$0]  %s51_s5, 256, %s191_s2, [#allocation4]  }
  0x36   :  { %133 = dma.done.wait [#allocation4], 256  }
  0x37   :  { %134 = vsyncadd [#allocation4], 4294967040 }
  0x38   :  { %57 = vsyncpa [#allocation3], 1 }
  0x39   :  { %58 = vsyncpa [#allocation6], 1 }
  0x3a   :  { %59 = vsyncpa [#allocation4], 1 }

</bundles_post_ra>
